<compile_context>
chip_gen: v5e
topology: v5e:2x2
jax: 0.10.0
libtpu: 0.0.40
codegen_flags: <defaults>
</compile_context>

<pallas_src>
import jax
import jax.numpy as jnp
from jax.experimental import pallas as pl
from jax.experimental.pallas import tpu as pltpu


def _round_up(x, m):
    return (x + m - 1) // m * m


def _cdiv(a, b):
    return (a + b - 1) // b


def _vmem_capacity_bytes():
    try:
        return int(pltpu.get_tpu_info().vmem_capacity_bytes)
    except Exception:
        return 64 * 1024 * 1024  # conservative (v7x per-TensorCore VMEM)


# --------------------------- kernels ---------------------------------------

def _resident_matmul_kernel(x_ref, wt_ref, o_ref):
    # wt block index is constant across the grid -> loaded from HBM once.
    o_ref[...] = jnp.dot(
        x_ref[...], wt_ref[...], preferred_element_type=jnp.float32
    ).astype(o_ref.dtype)


def _tiled_matmul_kernel_f32out(x_ref, wt_ref, o_ref):
    # f32 output: accumulate directly into the K-resident output block.
    @pl.when(pl.program_id(2) == 0)
    def _():
        o_ref[...] = jnp.zeros_like(o_ref)

    o_ref[...] += jnp.dot(
        x_ref[...], wt_ref[...], preferred_element_type=jnp.float32
    )


def _tiled_matmul_kernel(x_ref, wt_ref, o_ref, acc_ref):
    @pl.when(pl.program_id(2) == 0)
    def _():
        acc_ref[...] = jnp.zeros_like(acc_ref)

    acc_ref[...] += jnp.dot(
        x_ref[...], wt_ref[...], preferred_element_type=jnp.float32
    )

    @pl.when(pl.program_id(2) == pl.num_programs(2) - 1)
    def _():
        o_ref[...] = acc_ref[...].astype(o_ref.dtype)


# --------------------------- wrapper ----------------------------------------

def kron_linear_forward(x, A, B, *, block_m=512, block_n=512, block_k=512,
                        compute_dtype=jnp.bfloat16, allow_resident=True,
                        force_pallas=False):
    """Pallas implementation of KronLinear.forward(x, make_full_matrix=True)."""
    r, m1, n1 = A.shape
    r2, m2, n2 = B.shape
    assert r == r2
    d_in, d_out = m1 * m2, n1 * n2
    assert x.shape[-1] == d_in

    out_dtype = x.dtype
    compute_dtype = jnp.dtype(compute_dtype)
    out_itemsize = jnp.dtype(out_dtype).itemsize
    itemsize = compute_dtype.itemsize

    # Dense weight, built directly in transposed (d_in, d_out) layout so the
    # kernel is a plain x @ Wt (no full-weight XLA transpose copy).
    # TODO(synk): factored in-kernel contraction for very large d_in*d_out.
    wt = jnp.einsum('sia,sjb->ijab', A, B).reshape(d_in, d_out)

    lead = x.shape[:-1]
    x2 = x.reshape(-1, d_in)
    n_rows = x2.shape[0]

    sublane = 8 * (4 // itemsize)          # 8 for f32, 16 for bf16
    m_al = _round_up(n_rows, sublane)
    n_al = _round_up(d_out, 128)
    k_al = _round_up(d_in, 128)

    # Tiny problems: pallas_call fixed overhead + zero-padding waste exceed any
    # kernel win; let XLA's fused dot handle it.
    if not force_pallas and 2 * m_al * n_al * k_al < (1 << 22):
        y = jnp.dot(x2.astype(compute_dtype), wt.astype(compute_dtype),
                    preferred_element_type=jnp.float32).astype(out_dtype)
        return y.reshape(lead + (d_out,))

    x2 = x2.astype(compute_dtype)
    wt = wt.astype(compute_dtype)

    vmem_cap = _vmem_capacity_bytes()
    vmem_budget = int(vmem_cap * 3 // 4)   # never over-request physical VMEM

    # Balanced M tiles (no nearly-empty trailing tile), sublane-aligned.
    n_m_tiles = max(1, _cdiv(n_rows, block_m))
    tm = min(_round_up(_cdiv(n_rows, n_m_tiles), sublane), m_al)
    m_pad = _round_up(n_rows, tm)

    # ---- Resident-weight fast path -----------------------------------------
    wt_bytes = k_al * n_al * itemsize
    resident_vmem = (2 * wt_bytes                      # (possibly) double-buffered wt
                     + 2 * tm * k_al * itemsize        # double-buffered x tiles
                     + 2 * tm * n_al * out_itemsize    # double-buffered out tiles
                     + (1 << 20))                      # slack
    if allow_resident and resident_vmem <= vmem_budget:
        k_pad, n_pad = k_al, n_al
        if (m_pad, k_pad) != (n_rows, d_in):
            x2 = jnp.pad(x2, ((0, m_pad - n_rows), (0, k_pad - d_in)))
        if (k_pad, n_pad) != (d_in, d_out):
            wt = jnp.pad(wt, ((0, k_pad - d_in), (0, n_pad - d_out)))

        out = pl.pallas_call(
            _resident_matmul_kernel,
            out_shape=jax.ShapeDtypeStruct((m_pad, n_pad), out_dtype),
            grid_spec=pltpu.PrefetchScalarGridSpec(
                num_scalar_prefetch=0,
                grid=(m_pad // tm,),
                in_specs=[
                    pl.BlockSpec((tm, k_pad), lambda i: (i, 0)),
                    # Constant block index -> weight DMA'd from HBM once.
                    pl.BlockSpec((k_pad, n_pad), lambda i: (0, 0)),
                ],
                out_specs=pl.BlockSpec((tm, n_pad), lambda i: (i, 0)),
            ),
            compiler_params=pltpu.CompilerParams(
                dimension_semantics=("parallel",),
                vmem_limit_bytes=vmem_budget,
            ),
        )(x2, wt)
        out = out[:n_rows, :d_out]
        return out.reshape(lead + (d_out,))

    # ---- General tiled path (M, N, K grid; K innermost) --------------------
    tn = _round_up(min(block_n, n_al), 128)
    tk = _round_up(min(block_k, k_al), 128)
    n_pad = _round_up(d_out, tn)
    k_pad = _round_up(d_in, tk)

    if (m_pad, k_pad) != (n_rows, d_in):
        x2 = jnp.pad(x2, ((0, m_pad - n_rows), (0, k_pad - d_in)))
    if (k_pad, n_pad) != (d_in, d_out):
        wt = jnp.pad(wt, ((0, k_pad - d_in), (0, n_pad - d_out)))

    grid = (m_pad // tm, n_pad // tn, k_pad // tk)

    accumulate_in_out = jnp.dtype(out_dtype) == jnp.float32
    kernel = _tiled_matmul_kernel_f32out if accumulate_in_out else _tiled_matmul_kernel
    scratch = [] if accumulate_in_out else [pltpu.VMEM((tm, tn), jnp.float32)]

    tile_bytes = (2 * (tm * tk + tk * tn) * itemsize
                  + 2 * tm * tn * out_itemsize
                  + (0 if accumulate_in_out else tm * tn * 4))
    vmem_limit = min(vmem_budget, max(32 * 1024 * 1024, 2 * tile_bytes))

    out = pl.pallas_call(
        kernel,
        out_shape=jax.ShapeDtypeStruct((m_pad, n_pad), out_dtype),
        grid_spec=pltpu.PrefetchScalarGridSpec(
            num_scalar_prefetch=0,
            grid=grid,
            in_specs=[
                pl.BlockSpec((tm, tk), lambda i, j, k: (i, k)),
                pl.BlockSpec((tk, tn), lambda i, j, k: (k, j)),
            ],
            out_specs=pl.BlockSpec((tm, tn), lambda i, j, k: (i, j)),
            scratch_shapes=scratch,
        ),
        # TODO(synk): on v7x consider pltpu.CORE_PARALLEL on the M (or N) axis
        # when that grid dim >= 2; "parallel" is kept here for portability.
        compiler_params=pltpu.CompilerParams(
            dimension_semantics=("parallel", "parallel", "arbitrary"),
            vmem_limit_bytes=int(vmem_limit),
        ),
    )(x2, wt)

    out = out[:n_rows, :d_out]
    return out.reshape(lead + (d_out,))


def init_params(key, r, m1, n1, m2, n2, std=1e-3):
    # Matches nn.init.normal_(·, std=0.001) in __init__ (deterministic here).
    kA, kB = jax.random.split(key)
    A = std * jax.random.normal(kA, (r, m1, n1), jnp.float32)
    B = std * jax.random.normal(kB, (r, m2, n2), jnp.float32)
    return A, B


if __name__ == "__main__":
    # KronLinear(r=2, m1=4, n1=4, m2=8, n2=8): d_in = 32, d_out = 32.
    r, m1, n1, m2, n2 = 2, 4, 4, 8, 8
    batch, seq = 2, 8
    d_in, d_out = m1 * m2, n1 * n2

    key = jax.random.PRNGKey(0)
    kp, kx = jax.random.split(key)
    A, B = init_params(kp, r, m1, n1, m2, n2)
    x = jax.random.normal(kx, (batch, seq, d_in), jnp.float32)

    # Pure-JAX reference with the exact PyTorch math.
    W = jnp.einsum('sia,sjb->abij', A, B).reshape(d_out, d_in)
    y_ref = jnp.einsum('nd,bsd->bsn', W, x)

    # 1) Resident-weight Pallas path, f32 compute: strict parity.
    y = jax.block_until_ready(
        kron_linear_forward(x, A, B, compute_dtype=jnp.float32,
                            force_pallas=True))
    assert y.shape == (batch, seq, d_out), y.shape
    assert y.dtype == x.dtype
    assert jnp.allclose(y, y_ref, atol=1e-6, rtol=1e-5)

    # 2) Tiled M/N/K Pallas path (K accumulation into f32 output): strict parity.
    y_tiled = jax.block_until_ready(
        kron_linear_forward(x, A, B, compute_dtype=jnp.float32,
                            force_pallas=True, allow_resident=False))
    assert jnp.allclose(y_tiled, y_ref, atol=1e-6, rtol=1e-5)

    # 3) Default bf16-compute path (MXU-native): loose tolerance (bf16 quantizes
    #    x and the constructed weight; accumulation stays f32).
    y_bf16 = jax.block_until_ready(
        kron_linear_forward(x, A, B, force_pallas=True))
    assert y_bf16.dtype == x.dtype
    assert jnp.allclose(y_bf16, y_ref, atol=5e-6, rtol=5e-2)

    # 4) Tiny-problem fallback (plain fused dot, no pallas_call).
    y_fb = jax.block_until_ready(
        kron_linear_forward(x, A, B, compute_dtype=jnp.float32))
    assert jnp.allclose(y_fb, y_ref, atol=1e-6, rtol=1e-5)

    print("KERNEL_OK")
</pallas_src>

<mosaic_0001>
module attributes {stable_mosaic.version = 11 : i64} {
  func.func @_resident_matmul_kernel(%arg0: i32, %arg1: memref<16x128xf32, #tpu.memory_space<vmem>>, %arg2: memref<128x128xf32, #tpu.memory_space<vmem>>, %arg3: memref<16x128xf32, #tpu.memory_space<vmem>>) attributes {dimension_semantics = [#tpu.dimension_semantics<parallel>], iteration_bounds = array<i64: 1>, scalar_prefetch = 0 : i64, scratch_operands = 0 : i64, tpu.core_type = #tpu.core_type<tc>, window_params = [{transform_indices = @transform_0, window_bounds = array<i64: 16, 128>}, {pipeline_mode = #tpu.pipeline_mode<synchronous>, transform_indices = @transform_1, window_bounds = array<i64: 128, 128>}, {transform_indices = @transform_2, window_bounds = array<i64: 16, 128>}]} {
    %c0 = arith.constant 0 : index
    %c0_0 = arith.constant 0 : index
    %0 = vector.load %arg1[%c0, %c0_0] : memref<16x128xf32, #tpu.memory_space<vmem>>, vector<16x128xf32>
    %c0_1 = arith.constant 0 : index
    %c0_2 = arith.constant 0 : index
    %1 = vector.load %arg2[%c0_1, %c0_2] : memref<128x128xf32, #tpu.memory_space<vmem>>, vector<128x128xf32>
    %cst = arith.constant dense<0.000000e+00> : vector<16x128xf32>
    %2 = tpu.matmul %0, %1, %cst {dimension_numbers = #tpu.dot_dimension_numbers<[1], [0], [0], [1], [0, 0, 1, 1], [], []>} : vector<16x128xf32>, vector<128x128xf32>, vector<16x128xf32> -> vector<16x128xf32>
    %c0_3 = arith.constant 0 : index
    %c0_4 = arith.constant 0 : index
    %3 = vector.load %arg3[%c0_3, %c0_4] : memref<16x128xf32, #tpu.memory_space<vmem>>, vector<16x128xf32>
    tpu.vector_store %arg3[%c0_3, %c0_4], %2 {strides = array<i32>} : memref<16x128xf32, #tpu.memory_space<vmem>>, vector<16x128xf32>,
    return
  }
  func.func @transform_0(%arg0: i32) -> (i32, i32) {
    %c0_i32 = arith.constant 0 : i32
    %c0_i32_0 = arith.constant 0 : i32
    return %arg0, %c0_i32 : i32, i32
  }
  func.func @transform_1(%arg0: i32) -> (i32, i32) {
    %c0_i32 = arith.constant 0 : i32
    %c0_i32_0 = arith.constant 0 : i32
    %c0_i32_1 = arith.constant 0 : i32
    return %c0_i32, %c0_i32_0 : i32, i32
  }
  func.func @transform_2(%arg0: i32) -> (i32, i32) {
    %c0_i32 = arith.constant 0 : i32
    %c0_i32_0 = arith.constant 0 : i32
    return %arg0, %c0_i32 : i32, i32
  }
}

</mosaic_0001>

<bundles_post_ra>
// kernel: tpu_custom_call.1
= control target key start
LH: loop header
LB: loop body
LE: loop exit
PB: predicated region body
PF: predicated region fallthrough
CT: control target
= control target key end

     0   :  { %7 = vsyncpa [#allocation3], 0  ;;  %s244_s0 = inlined_call_operand.hbm [shape: f32[16,128], index: 0, kind: input, shape index: {}]   ;;  %s245_s1 = inlined_call_operand.hbm [shape: f32[128,128], index: 1, kind: input, shape index: {}]   ;;  %s246_s2 = inlined_call_operand.hbm [shape: f32[16,128], index: 2, kind: output, shape index: {}]  }
   0x1   :  { %8 = vsyncpa [#allocation6], 0 }
   0x2   :  { %9 = vsyncpa [#allocation4], 0  ;;  %s14_s11 = sshll.u32 %s244_s0, 4  ;;  %s206_s12 = smov [#allocation2]   ;;  %s15_s11 = int_to_ptr.hbm [resolvable:$true] %s14_s11 }
   0x3   :  { %s16_s13 = sshll.u32 %s206_s12, 4  ;;  %s27_s16 = sshll.u32 %s245_s1, 4  ;;  %s17_s13 = int_to_ptr.vmem [resolvable:$true] %s16_s13  ;;  %s28_s16 = int_to_ptr.hbm [resolvable:$true] %s27_s16 }
   0x4   :  { %s207_s17 = smov 128   ;;  %s208_s18 = smov 8  }
   0x5   :  { %22 = dma.hbm_to_vmem [thread:$0]  %s15_s11, 256, %s17_s13, [#allocation3], %s207_s17, %s207_s17, %s208_s18  }
   0x6   :  { %s209_s19 = smov [#allocation5]  }
   0x7   :  { %s29_s20 = sshll.u32 %s209_s19, 4  ;;  %s30_s20 = int_to_ptr.vmem [resolvable:$true] %s29_s20 }
   0x8   :  { %35 = dma.hbm_to_vmem [thread:$0]  %s28_s16, 2048, %s30_s20, [#allocation6], %s207_s17, %s207_s17, %s208_s18  }
   0x9   :  { %200 = dma.done.wait [#allocation3], 256  }
   0xa   :  { %201 = vsyncadd [#allocation3], 4294967040 }
   0xb   :  { %202 = dma.done.wait [#allocation6], 2048  }
   0xc   :  { %203 = vsyncadd [#allocation6], 4294965248  ;;  %v61_v0 = vld [vmem:[#allocation5 + $0x78] sm:$0xff]  ;;  %v60_v1 = vld [vmem:[#allocation5 + $0x70] sm:$0xff]  ;;  %s210_s0 = smov [#allocation7]   ;;  %s93_s23 = sshll.u32 %s246_s2, 4  ;;  %s94_s23 = int_to_ptr.hbm [resolvable:$true] %s93_s23 }
   0xd   :  { %62 = vmatpush.msra.mxu0 %v61_v0  ;;  %107 = vmatpush.msra.mxu1 %v61_v0  ;;  %v59_v2 = vld [vmem:[#allocation5 + $0x68] sm:$0xff]  ;;  %v58_v3 = vld [vmem:[#allocation5 + $0x60] sm:$0xff]  ;;  %v57_v4 = vld [vmem:[#allocation5 + $0x58] sm:$0xff]  ;;  %s91_s1 = sshll.u32 %s210_s0, 4  ;;  %s92_s1 = int_to_ptr.vmem [resolvable:$true] %s91_s1 }
   0xe   :  { %v56_v5 = vld [vmem:[#allocation5 + $0x50] sm:$0xff]  ;;  %v55_v6 = vld [vmem:[#allocation5 + $0x48] sm:$0xff]  ;;  %v54_v7 = vld [vmem:[#allocation5 + $0x40] sm:$0xff] }
   0xf   :  { %63 = vmatpush.msra.mxu0 %v60_v1  ;;  %108 = vmatpush.msra.mxu1 %v60_v1  ;;  %v53_v8 = vld [vmem:[#allocation5 + $0x38] sm:$0xff]  ;;  %v52_v9 = vld [vmem:[#allocation5 + $0x30] sm:$0xff]  ;;  %v51_v10 = vld [vmem:[#allocation5 + $0x28] sm:$0xff] }
  0x10   :  { %v50_v11 = vld [vmem:[#allocation5 + $0x20] sm:$0xff]  ;;  %v49_v12 = vld [vmem:[#allocation5 + $0x18] sm:$0xff]  ;;  %v48_v13 = vld [vmem:[#allocation5 + $0x10] sm:$0xff] }
  0x11   :  { %64 = vmatpush.msra.mxu0 %v59_v2  ;;  %109 = vmatpush.msra.mxu1 %v59_v2  ;;  %v47_v14 = vld [vmem:[#allocation5 + $0x8] sm:$0xff]  ;;  %v46_v15 = vld [vmem:[#allocation5] sm:$0xff]  ;;  %v44_v16 = vld [vmem:[#allocation2] sm:$0xff] }
  0x12   :  { %v45_v17 = vld [vmem:[#allocation2 + $0x8] sm:$0xff] }
  0x13   :  { %65 = vmatpush.msra.mxu0 %v58_v3  ;;  %110 = vmatpush.msra.mxu1 %v58_v3 }
  0x15   :  { %66 = vmatpush.msra.mxu0 %v57_v4  ;;  %111 = vmatpush.msra.mxu1 %v57_v4 }
  0x17   :  { %67 = vmatpush.msra.mxu0 %v56_v5  ;;  %112 = vmatpush.msra.mxu1 %v56_v5 }
  0x19   :  { %68 = vmatpush.msra.mxu0 %v55_v6  ;;  %113 = vmatpush.msra.mxu1 %v55_v6 }
  0x1b   :  { %69 = vmatpush.msra.mxu0 %v54_v7  ;;  %114 = vmatpush.msra.mxu1 %v54_v7 }
  0x1d   :  { %70 = vmatpush.msra.mxu0 %v53_v8  ;;  %115 = vmatpush.msra.mxu1 %v53_v8 }
  0x1f   :  { %71 = vmatpush.msra.mxu0 %v52_v9  ;;  %116 = vmatpush.msra.mxu1 %v52_v9 }
  0x21   :  { %72 = vmatpush.msra.mxu0 %v51_v10  ;;  %117 = vmatpush.msra.mxu1 %v51_v10 }
  0x23   :  { %73 = vmatpush.msra.mxu0 %v50_v11  ;;  %118 = vmatpush.msra.mxu1 %v50_v11 }
  0x25   :  { %74 = vmatpush.msra.mxu0 %v49_v12  ;;  %119 = vmatpush.msra.mxu1 %v49_v12 }
  0x27   :  { %75 = vmatpush.msra.mxu0 %v48_v13  ;;  %120 = vmatpush.msra.mxu1 %v48_v13 }
  0x29   :  { %76 = vmatpush.msra.mxu0 %v47_v14  ;;  %121 = vmatpush.msra.mxu1 %v47_v14 }
  0x2b   :  { %77 = vmatpush.msra.mxu0 %v46_v15  ;;  %122 = vmatpush.msra.mxu1 %v46_v15 }
  0x2c   :  { %78 = vmatmul.f32.vlgmr.msra.gmra.mxu0 %v44_v16  ;;  %81 = vmatmul.f32.vlgmr.msra.gmra.mxu1 %v45_v17 }
  0xa9   :  { %v79_v18 = vpop.f32.mrf.mxu0  ;;  %v82_v19 = vpop.f32.mrf.mxu1 }
  0xaa   :  { %85 = vst [vmem:[#allocation7] sm:$0xff] %v79_v18 }
  0xab   :  { %86 = vst [vmem:[#allocation7 + $0x8] sm:$0xff] %v82_v19 }
  0xac   :  { %99 = dma.vmem_to_hbm [thread:$0]  %s92_s1, 256, %s94_s23, [#allocation4], %s207_s17, %s207_s17, %s208_s18  }
  0xad   :  { %204 = dma.done.wait [#allocation4], 256  }
  0xae   :  { %205 = vsyncadd [#allocation4], 4294967040 }
  0xaf   :  { %104 = vsyncpa [#allocation3], 1 }
  0xb0   :  { %105 = vsyncpa [#allocation6], 1 }
  0xb1   :  { %106 = vsyncpa [#allocation4], 1 }

</bundles_post_ra>
